<compile_context>
chip_gen: v5e
topology: v5e:2x2
jax: 0.10.0
libtpu: 0.0.40
codegen_flags: <defaults>
</compile_context>

<pallas_src>
import jax
import jax.numpy as jnp
import numpy as np
from jax import lax
from jax.experimental import pallas as pl
from jax.experimental.pallas import tpu as pltpu

NUM_CLASSES = 19
IGNORE_LABEL = 255


def _make_kernel(hw, ignore_label):
    def kernel(pred_ref, tgt_ref, s_ref, v_ref, f_ref):
        # pred_ref: (1, C, T)  logits tile (native dtype, pixels on lanes)
        # tgt_ref : (1, 1, T)  int32 target tile
        # s/v/f_ref: (1, C, T) f32 lane-partial accumulators (resident over hw tiles)
        i = pl.program_id(1)

        @pl.when(i == 0)
        def _():
            s_ref[...] = jnp.zeros_like(s_ref)
            v_ref[...] = jnp.zeros_like(v_ref)
            f_ref[...] = jnp.zeros_like(f_ref)

        logits = pred_ref[0].astype(jnp.float32)            # (C, T)
        tgt = tgt_ref[0]                                     # (1, T)
        c, t = logits.shape

        # Mask lanes past the true pixel count (handles a partial last tile
        # without padding logits in HBM).  `hw` and `t` are static.
        pix = lax.broadcasted_iota(jnp.int32, (1, t), 1) + i * t
        in_range = pix < hw                                  # (1, T)

        class_ids = lax.broadcasted_iota(jnp.int32, (c, t), 0)
        onehot = class_ids == tgt                            # (C, T)
        label_valid = (tgt >= 0) & (tgt != ignore_label)     # (1, T)

        # Numerically stable log-softmax along the class (sublane) axis.
        m = jnp.max(logits, axis=0, keepdims=True)           # (1, T)
        z = logits - m
        lse = jnp.log(jnp.sum(jnp.exp(z), axis=0, keepdims=True))
        neg_logp = lse - z                                   # (C, T) = -log softmax

        sel = onehot & label_valid & in_range                # valid target-class one-hot
        cnt = onehot & in_range                              # all-pixel class one-hot

        # Lane-partial accumulation only: pure VALU adds, no per-tile cross-lane
        # reduction and no concatenate.  Select (not multiply) so garbage lanes
        # of a partial tile cannot inject NaN/Inf.
        s_ref[0] += jnp.where(sel, neg_logp, 0.0)
        v_ref[0] += sel.astype(jnp.float32)
        f_ref[0] += cnt.astype(jnp.float32)

    return kernel


def cross_entropy_2d(predict, target, tile_hw=16384):
    """predict: (n, c, h, w) float logits (NCHW); target: (n, h, w) int labels."""
    n, c, h, w = predict.shape
    assert target.shape == (n, h, w)
    hw = h * w

    # Zero-copy reshapes: keep the channel-major NCHW layout, pixels on lanes.
    pred = predict.reshape(n, c, hw)
    tgt = target.reshape(n, 1, hw).astype(jnp.int32)

    if hw <= tile_hw:
        t = hw                                   # full-dim block (always legal)
    else:
        t = max(128, (tile_hw // 128) * 128)     # lane-dense multiple of 128
    num_tiles = pl.cdiv(hw, t)

    kernel = _make_kernel(hw, IGNORE_LABEL)
    acc_shape = jax.ShapeDtypeStruct((n, c, t), jnp.float32)
    acc_spec = pl.BlockSpec((1, c, t), lambda b, i: (b, 0, 0))

    s_acc, v_acc, f_acc = pl.pallas_call(
        kernel,
        out_shape=(acc_shape, acc_shape, acc_shape),
        grid_spec=pltpu.PrefetchScalarGridSpec(
            num_scalar_prefetch=0,
            grid=(n, num_tiles),
            in_specs=[
                pl.BlockSpec((1, c, t), lambda b, i: (b, 0, i)),
                pl.BlockSpec((1, 1, t), lambda b, i: (b, 0, i)),
            ],
            out_specs=(acc_spec, acc_spec, acc_spec),
        ),
        compiler_params=pltpu.CompilerParams(
            dimension_semantics=("parallel", "arbitrary")),
    )(pred, tgt)

    # Tiny glue: collapse lane partials + batch, then the 19-element weighting.
    s = jnp.sum(s_acc, axis=(0, 2))              # (C,)
    v = jnp.sum(v_acc, axis=(0, 2))              # (C,)
    f = jnp.sum(f_acc, axis=(0, 2))              # (C,)
    weight = f / jnp.sum(f)                      # online class weight = freq / sum(freq)
    loss = jnp.sum(weight * s) / jnp.sum(weight * v)
    return loss


def _reference_loss(predict, target):
    """Pure-JAX reference mirroring the PyTorch module semantics."""
    n, c, h, w = predict.shape
    freq = jnp.stack([jnp.sum(target == k).astype(jnp.float32) for k in range(c)])
    weight = freq / jnp.sum(freq)
    valid = ((target >= 0) & (target != IGNORE_LABEL)).reshape(-1).astype(jnp.float32)
    logits = jnp.transpose(predict, (0, 2, 3, 1)).reshape(-1, c).astype(jnp.float32)
    tvals = jnp.clip(target.reshape(-1), 0, c - 1)
    logp = jax.nn.log_softmax(logits, axis=-1)
    nll = -jnp.take_along_axis(logp, tvals[:, None], axis=1)[:, 0]
    wgt = weight[tvals]
    return jnp.sum(wgt * nll * valid) / jnp.sum(wgt * valid)


if __name__ == "__main__":
    key = jax.random.PRNGKey(0)
    k1, k2, k3 = jax.random.split(key, 3)

    n, c, h, w = 2, NUM_CLASSES, 16, 16
    predict = jax.random.normal(k1, (n, c, h, w), dtype=jnp.float32)
    target = jax.random.randint(k2, (n, h, w), 0, NUM_CLASSES, dtype=jnp.int32)
    # Sprinkle some ignore labels to exercise the ignore_label path.
    ignore_mask = jax.random.bernoulli(k3, 0.1, (n, h, w))
    target = jnp.where(ignore_mask, IGNORE_LABEL, target)

    loss = jax.block_until_ready(cross_entropy_2d(predict, target))
    ref = jax.block_until_ready(_reference_loss(predict, target))

    assert np.isfinite(float(loss))
    np.testing.assert_allclose(float(loss), float(ref), rtol=1e-5, atol=1e-5)
    print("KERNEL_OK")
</pallas_src>

<mosaic_0001>
module attributes {stable_mosaic.version = 11 : i64} {
  func.func @kernel(%arg0: i32, %arg1: i32, %arg2: memref<1x19x256xf32, #tpu.memory_space<vmem>>, %arg3: memref<1x1x256xi32, #tpu.memory_space<vmem>>, %arg4: memref<1x19x256xf32, #tpu.memory_space<vmem>>, %arg5: memref<1x19x256xf32, #tpu.memory_space<vmem>>, %arg6: memref<1x19x256xf32, #tpu.memory_space<vmem>>) attributes {dimension_semantics = [#tpu.dimension_semantics<parallel>, #tpu.dimension_semantics<arbitrary>], iteration_bounds = array<i64: 2, 1>, scalar_prefetch = 0 : i64, scratch_operands = 0 : i64, tpu.core_type = #tpu.core_type<tc>, window_params = [{transform_indices = @transform_0, window_bounds = array<i64: 1, 19, 256>}, {transform_indices = @transform_1, window_bounds = array<i64: 1, 1, 256>}, {transform_indices = @transform_2, window_bounds = array<i64: 1, 19, 256>}, {transform_indices = @transform_3, window_bounds = array<i64: 1, 19, 256>}, {transform_indices = @transform_4, window_bounds = array<i64: 1, 19, 256>}]} {
    %c0_i32 = arith.constant 0 : i32
    %0 = arith.cmpi eq, %arg1, %c0_i32 : i32
    %1 = arith.extui %0 : i1 to i32
    %c0_i32_0 = arith.constant 0 : i32
    %2 = arith.cmpi ne, %1, %c0_i32_0 : i32
    scf.if %2 {
      %cst_28 = arith.constant 0.000000e+00 : f32
      %61 = vector.broadcast %cst_28 : f32 to vector<1x19x256xf32>
      %c0_29 = arith.constant 0 : index
      %c0_30 = arith.constant 0 : index
      %c0_31 = arith.constant 0 : index
      %62 = vector.load %arg4[%c0_29, %c0_30, %c0_31] : memref<1x19x256xf32, #tpu.memory_space<vmem>>, vector<1x19x256xf32>
      tpu.vector_store %arg4[%c0_29, %c0_30, %c0_31], %61 {strides = array<i32>} : memref<1x19x256xf32, #tpu.memory_space<vmem>>, vector<1x19x256xf32>,
      %cst_32 = arith.constant 0.000000e+00 : f32
      %63 = vector.broadcast %cst_32 : f32 to vector<1x19x256xf32>
      %c0_33 = arith.constant 0 : index
      %c0_34 = arith.constant 0 : index
      %c0_35 = arith.constant 0 : index
      %64 = vector.load %arg5[%c0_33, %c0_34, %c0_35] : memref<1x19x256xf32, #tpu.memory_space<vmem>>, vector<1x19x256xf32>
      tpu.vector_store %arg5[%c0_33, %c0_34, %c0_35], %63 {strides = array<i32>} : memref<1x19x256xf32, #tpu.memory_space<vmem>>, vector<1x19x256xf32>,
      %cst_36 = arith.constant 0.000000e+00 : f32
      %65 = vector.broadcast %cst_36 : f32 to vector<1x19x256xf32>
      %c0_37 = arith.constant 0 : index
      %c0_38 = arith.constant 0 : index
      %c0_39 = arith.constant 0 : index
      %66 = vector.load %arg6[%c0_37, %c0_38, %c0_39] : memref<1x19x256xf32, #tpu.memory_space<vmem>>, vector<1x19x256xf32>
      tpu.vector_store %arg6[%c0_37, %c0_38, %c0_39], %65 {strides = array<i32>} : memref<1x19x256xf32, #tpu.memory_space<vmem>>, vector<1x19x256xf32>,
    } else {
    }
    %c0 = arith.constant 0 : index
    %c0_1 = arith.constant 0 : index
    %c0_2 = arith.constant 0 : index
    %3 = vector.load %arg2[%c0, %c0_1, %c0_2] : memref<1x19x256xf32, #tpu.memory_space<vmem>>, vector<1x19x256xf32>
    %4 = vector.shape_cast %3 : vector<1x19x256xf32> to vector<19x256xf32>
    %c0_3 = arith.constant 0 : index
    %c0_4 = arith.constant 0 : index
    %c0_5 = arith.constant 0 : index
    %5 = vector.load %arg3[%c0_3, %c0_4, %c0_5] : memref<1x1x256xi32, #tpu.memory_space<vmem>>, vector<1x1x256xi32>
    %6 = vector.shape_cast %5 : vector<1x1x256xi32> to vector<1x256xi32>
    %7 = tpu.iota {dimensions = array<i32: 1>} : vector<1x256xi32>
    %c256_i32 = arith.constant 256 : i32
    %8 = arith.muli %arg1, %c256_i32 : i32
    %9 = vector.broadcast %8 : i32 to vector<1x256xi32>
    %10 = arith.addi %7, %9 : vector<1x256xi32>
    %c256_i32_6 = arith.constant 256 : i32
    %11 = vector.broadcast %c256_i32_6 : i32 to vector<1x256xi32>
    %12 = arith.cmpi slt, %10, %11 : vector<1x256xi32>
    %13 = tpu.iota {dimensions = array<i32: 0>} : vector<19x256xi32>
    %14 = vector.broadcast %6 : vector<1x256xi32> to vector<19x256xi32>
    %15 = arith.cmpi eq, %13, %14 : vector<19x256xi32>
    %c0_i32_7 = arith.constant 0 : i32
    %16 = vector.broadcast %c0_i32_7 : i32 to vector<1x256xi32>
    %17 = arith.cmpi sge, %6, %16 : vector<1x256xi32>
    %c255_i32 = arith.constant 255 : i32
    %18 = vector.broadcast %c255_i32 : i32 to vector<1x256xi32>
    %19 = arith.cmpi ne, %6, %18 : vector<1x256xi32>
    %20 = arith.andi %17, %19 : vector<1x256xi1>
    %cst = arith.constant dense<0xFF800000> : vector<256xf32>
    %21 = vector.multi_reduction <maximumf>, %4, %cst [0] : vector<19x256xf32> to vector<256xf32>
    %22 = vector.shape_cast %21 : vector<256xf32> to vector<1x256xf32>
    %23 = vector.broadcast %22 : vector<1x256xf32> to vector<19x256xf32>
    %24 = arith.subf %4, %23 : vector<19x256xf32>
    %25 = math.exp %24 : vector<19x256xf32>
    %cst_8 = arith.constant dense<0.000000e+00> : vector<256xf32>
    %26 = vector.multi_reduction <add>, %25, %cst_8 [0] : vector<19x256xf32> to vector<256xf32>
    %27 = vector.shape_cast %26 : vector<256xf32> to vector<1x256xf32>
    %28 = math.log %27 : vector<1x256xf32>
    %29 = vector.broadcast %28 : vector<1x256xf32> to vector<19x256xf32>
    %30 = arith.subf %29, %24 : vector<19x256xf32>
    %31 = vector.broadcast %20 : vector<1x256xi1> to vector<19x256xi1>
    %32 = arith.andi %15, %31 : vector<19x256xi1>
    %33 = vector.broadcast %12 : vector<1x256xi1> to vector<19x256xi1>
    %34 = arith.andi %32, %33 : vector<19x256xi1>
    %35 = vector.broadcast %12 : vector<1x256xi1> to vector<19x256xi1>
    %36 = arith.andi %15, %35 : vector<19x256xi1>
    %c0_9 = arith.constant 0 : index
    %c0_10 = arith.constant 0 : index
    %c0_11 = arith.constant 0 : index
    %37 = vector.load %arg4[%c0_9, %c0_10, %c0_11] : memref<1x19x256xf32, #tpu.memory_space<vmem>>, vector<1x19x256xf32>
    %38 = vector.shape_cast %37 : vector<1x19x256xf32> to vector<19x256xf32>
    %cst_12 = arith.constant 0.000000e+00 : f32
    %39 = vector.broadcast %cst_12 : f32 to vector<19x256xf32>
    %40 = arith.select %34, %30, %39 : vector<19x256xi1>, vector<19x256xf32>
    %41 = arith.addf %38, %40 : vector<19x256xf32>
    %c0_13 = arith.constant 0 : index
    %c0_14 = arith.constant 0 : index
    %c0_15 = arith.constant 0 : index
    %42 = vector.load %arg4[%c0_13, %c0_14, %c0_15] : memref<1x19x256xf32, #tpu.memory_space<vmem>>, vector<1x19x256xf32>
    %43 = vector.shape_cast %42 : vector<1x19x256xf32> to vector<19x256xf32>
    %44 = vector.shape_cast %41 : vector<19x256xf32> to vector<1x19x256xf32>
    tpu.vector_store %arg4[%c0_13, %c0_14, %c0_15], %44 {strides = array<i32>} : memref<1x19x256xf32, #tpu.memory_space<vmem>>, vector<1x19x256xf32>,
    %c0_16 = arith.constant 0 : index
    %c0_17 = arith.constant 0 : index
    %c0_18 = arith.constant 0 : index
    %45 = vector.load %arg5[%c0_16, %c0_17, %c0_18] : memref<1x19x256xf32, #tpu.memory_space<vmem>>, vector<1x19x256xf32>
    %46 = vector.shape_cast %45 : vector<1x19x256xf32> to vector<19x256xf32>
    %47 = arith.extui %34 : vector<19x256xi1> to vector<19x256xi32>
    %48 = arith.sitofp %47 : vector<19x256xi32> to vector<19x256xf32>
    %49 = arith.addf %46, %48 : vector<19x256xf32>
    %c0_19 = arith.constant 0 : index
    %c0_20 = arith.constant 0 : index
    %c0_21 = arith.constant 0 : index
    %50 = vector.load %arg5[%c0_19, %c0_20, %c0_21] : memref<1x19x256xf32, #tpu.memory_space<vmem>>, vector<1x19x256xf32>
    %51 = vector.shape_cast %50 : vector<1x19x256xf32> to vector<19x256xf32>
    %52 = vector.shape_cast %49 : vector<19x256xf32> to vector<1x19x256xf32>
    tpu.vector_store %arg5[%c0_19, %c0_20, %c0_21], %52 {strides = array<i32>} : memref<1x19x256xf32, #tpu.memory_space<vmem>>, vector<1x19x256xf32>,
    %c0_22 = arith.constant 0 : index
    %c0_23 = arith.constant 0 : index
    %c0_24 = arith.constant 0 : index
    %53 = vector.load %arg6[%c0_22, %c0_23, %c0_24] : memref<1x19x256xf32, #tpu.memory_space<vmem>>, vector<1x19x256xf32>
    %54 = vector.shape_cast %53 : vector<1x19x256xf32> to vector<19x256xf32>
    %55 = arith.extui %36 : vector<19x256xi1> to vector<19x256xi32>
    %56 = arith.sitofp %55 : vector<19x256xi32> to vector<19x256xf32>
    %57 = arith.addf %54, %56 : vector<19x256xf32>
    %c0_25 = arith.constant 0 : index
    %c0_26 = arith.constant 0 : index
    %c0_27 = arith.constant 0 : index
    %58 = vector.load %arg6[%c0_25, %c0_26, %c0_27] : memref<1x19x256xf32, #tpu.memory_space<vmem>>, vector<1x19x256xf32>
    %59 = vector.shape_cast %58 : vector<1x19x256xf32> to vector<19x256xf32>
    %60 = vector.shape_cast %57 : vector<19x256xf32> to vector<1x19x256xf32>
    tpu.vector_store %arg6[%c0_25, %c0_26, %c0_27], %60 {strides = array<i32>} : memref<1x19x256xf32, #tpu.memory_space<vmem>>, vector<1x19x256xf32>,
    return
  }
  func.func @transform_0(%arg0: i32, %arg1: i32) -> (i32, i32, i32) {
    %c0_i32 = arith.constant 0 : i32
    %c0_i32_0 = arith.constant 0 : i32
    return %arg0, %c0_i32, %arg1 : i32, i32, i32
  }
  func.func @transform_1(%arg0: i32, %arg1: i32) -> (i32, i32, i32) {
    %c0_i32 = arith.constant 0 : i32
    %c0_i32_0 = arith.constant 0 : i32
    return %arg0, %c0_i32, %arg1 : i32, i32, i32
  }
  func.func @transform_2(%arg0: i32, %arg1: i32) -> (i32, i32, i32) {
    %c0_i32 = arith.constant 0 : i32
    %c0_i32_0 = arith.constant 0 : i32
    %c0_i32_1 = arith.constant 0 : i32
    return %arg0, %c0_i32, %c0_i32_0 : i32, i32, i32
  }
  func.func @transform_3(%arg0: i32, %arg1: i32) -> (i32, i32, i32) {
    %c0_i32 = arith.constant 0 : i32
    %c0_i32_0 = arith.constant 0 : i32
    %c0_i32_1 = arith.constant 0 : i32
    return %arg0, %c0_i32, %c0_i32_0 : i32, i32, i32
  }
  func.func @transform_4(%arg0: i32, %arg1: i32) -> (i32, i32, i32) {
    %c0_i32 = arith.constant 0 : i32
    %c0_i32_0 = arith.constant 0 : i32
    %c0_i32_1 = arith.constant 0 : i32
    return %arg0, %c0_i32, %c0_i32_0 : i32, i32, i32
  }
}

</mosaic_0001>

<bundles_post_ra>
// kernel: tpu_custom_call.1
= control target key start
LH: loop header
LB: loop body
LE: loop exit
PB: predicated region body
PF: predicated region fallthrough
CT: control target
= control target key end

     0   :  { %s781_s15 = smov 0   ;;  %s783_s16 = smov 0   ;;  %s1011_s0 = inlined_call_operand.vmem [shape: f32[2,19,256], index: 0, kind: input, shape index: {}]   ;;  %s1012_s1 = inlined_call_operand.vmem [shape: s32[2,1,256], index: 1, kind: input, shape index: {}]   ;;  %s1013_s2 = inlined_call_operand.vmem [shape: f32[2,19,256], index: 2, kind: output, shape index: {0}]   ;;  %s1014_s3 = inlined_call_operand.vmem [shape: f32[2,19,256], index: 3, kind: output, shape index: {1}]   ;;  %s1015_s4 = inlined_call_operand.vmem [shape: f32[2,19,256], index: 4, kind: output, shape index: {2}]  }
   0x1   :  { %s785_s17 = smov 0  }
   0x2 LB: > { %s27_s18 = sadd.s32 1, %s748_s16  ;;  %p667_p0 = scmp.ge.s32.totalorder %s752_s17, 1  ;;  %s752_s17 = sphi %s785_s17, %s15_s17   ;;  %s748_s16 = sphi %s783_s16, %s1033_s16   ;;  %s744_s15 = sphi %s781_s15, %s1032_s15  }
   0x3   : > { %p29_p1 = scmp.ge.s32.totalorder %s27_s18, 2  ;;  %p202_p2 = scmp.lt.s32.totalorder %s752_s17, 3 }
   0x5   : > { %s1035_s18 = smov (%p29_p1, %s27_s18), 0  ;;  %p203_p3 = pnand %p667_p0, %p202_p2 }
   0x6   : > { %p251_p4 = scmp.lt.s32.totalorder (!%p203_p3), %s744_s15, 1 }
   0x7   : > { %206 = sbr.rel (%p203_p3) target bundleno = 82 (0x52), region = 28 }
   0xc   : > { %s1037_s15 = smov (!%p251_p4, %s744_s15), 1  ;;  %vm337_vm0 = vcmask 1042432   ;;  %v754_v0 = vmov 0.0   ;;  %v322_v25 = vlaneseq  ;;  %v755_v36 = vmov 0  }
   0xd   : > { %s687_s19 = smul.u32 48, %s1037_s15  ;;  %s669_s6 = sshll.u32 %s1037_s15, 1 }
   0xe   : > { %s267_s9 = scalar_lea.vmem %s1012_s1, %s669_s6  ;;  %v323_v35 = vshrl.u32 %v322_v25, 7 }
   0xf   : > { %s805_s22 = scalar_lea.vmem %s1013_s2, %s687_s19  ;;  %s810_s25 = scalar_lea.vmem %s1014_s3, %s687_s19  ;;  %v312_v18 = vld [vmem:[%s267_s9] sm:$0x3] }
  0x10   : > { %292 = vst [vmem:[%s805_s22 + $0x20] sm:$0x7] %v754_v0  ;;  %s258_s28 = scalar_lea.vmem %s1011_s0, %s687_s19  ;;  %s822_s5 = scalar_lea.vmem %s1015_s4, %s687_s19  ;;  %vm334_vm1 = vcmp.ge.s32.totalorder %v312_v18, 0  ;;  %vm335_vm2 = vcmp.ne.s32.totalorder %v312_v18, 255  ;;  %v844_v30 = vperm.slane %v312_v18, 0  ;;  %v855_v41 = vperm.slane %v312_v18, 1 }
  0x11   : > { %293 = vst [vmem:[%s805_s22 + $0x28] sm:$0x7] %v754_v0  ;;  %v306_v1 = vld [vmem:[%s258_s28] sm:$0xff]  ;;  %v308_v3 = vld [vmem:[%s258_s28 + $0x10] sm:$0xff]  ;;  %v307_v5 = vld [vmem:[%s258_s28 + $0x8] sm:$0xff]  ;;  %v324_v47 = vadd.s32 8, %v323_v35 }
  0x12   : > { %v310_v2 = vld [vmem:[%s258_s28 + $0x20] sm:$0x7]  ;;  %298 = vst [vmem:[%s810_s25 + $0x20] sm:$0x7] %v754_v0  ;;  %v311_v7 = vld [vmem:[%s258_s28 + $0x28] sm:$0x7]  ;;  %vm336_vm3 = vmand %vm334_vm1, %vm335_vm2  ;;  %vm328_vm4 = vcmp.eq.s32.totalorder %v323_v35, %v844_v30  ;;  %vm329_vm6 = vcmp.eq.s32.totalorder %v323_v35, %v855_v41 }
  0x13   : > { %v338_v4 = vsel %vm337_vm0, %v310_v2, -inf  ;;  %299 = vst [vmem:[%s810_s25 + $0x28] sm:$0x7] %v754_v0  ;;  %v309_v8 = vld [vmem:[%s258_s28 + $0x18] sm:$0xff]  ;;  %v347_v9 = vsel %vm337_vm0, %v311_v7, -inf  ;;  %v402_v37 = vsel %vm336_vm3, 1, %v755_v36  ;;  %vm330_vm10 = vcmp.eq.s32.totalorder %v324_v47, %v844_v30 }
  0x14   : > { %v339_v6 = vmax.f32 %v306_v1, %v338_v4  ;;  %304 = vst [vmem:[%s822_s5 + $0x20] sm:$0x7] %v754_v0  ;;  %v348_v11 = vmax.f32 %v307_v5, %v347_v9  ;;  %v403_v40 = vperm.slane %v402_v37, 0  ;;  %v404_v46 = vperm.slane %v402_v37, 1 }
  0x15   : > { %305 = vst [vmem:[%s822_s5 + $0x28] sm:$0x7] %v754_v0  ;;  %v325_v48 = vadd.s32 16, %v323_v35  ;;  %vm331_vm11 = vcmp.eq.s32.totalorder %v324_v47, %v855_v41  ;;  %v681_v18 = vsel %vm330_vm10, 1.0, %v754_v0 }
  0x16   : > { %v340_v10 = vmax.f32 %v339_v6, %v308_v3  ;;  %v349_v13 = vmax.f32 %v348_v11, %v309_v8  ;;  %vm861_vm5 = vcmp.eq.s32.totalorder %v403_v40, 1  ;;  %vm874_vm8 = vcmp.eq.s32.totalorder %v404_v46, 1  ;;  %509 = vst [vmem:[%s822_s5 + $0x10] sm:$0xff] %v681_v18 }
  0x17   : > { %vm870_vm7 = vmand %vm328_vm4, %vm861_vm5  ;;  %vm332_vm12 = vcmp.eq.s32.totalorder %v325_v48, %v844_v30  ;;  %vm333_vm14 = vcmp.eq.s32.totalorder %v325_v48, %v855_v41  ;;  %v433_v50 = vld [vmem:[%s805_s22 + $0x20] sm:$0x7] }
  0x18   : > { %v341_v12 = vrot.slane %v340_v10, 4  ;;  %v350_v15 = vrot.slane %v349_v13, 4  ;;  %vm882_vm9 = vmand %vm329_vm6, %vm874_vm8  ;;  %v673_v59 = vsel %vm870_vm7, 1.0, %v754_v0  ;;  %v684_v25 = vsel %vm333_vm14, 1.0, %v754_v0 }
  0x19   : > { %vm893_vm13 = vmand %vm330_vm10, %vm861_vm5  ;;  %v674_v60 = vsel %vm882_vm9, 1.0, %v754_v0  ;;  %v457_v62 = vld [vmem:[%s810_s25 + $0x20] sm:$0x7]  ;;  %477 = vst [vmem:[%s810_s25] sm:$0xff] %v673_v59  ;;  %v434_v59 = vld [vmem:[%s805_s22 + $0x28] sm:$0x7] }
  0x1a   : > { %v342_v14 = vmax.f32 %v340_v10, %v341_v12  ;;  %v351_v17 = vmax.f32 %v349_v13, %v350_v15  ;;  %vm902_vm15 = vmand %vm331_vm11, %vm874_vm8  ;;  %v675_v61 = vsel %vm893_vm13, 1.0, %v754_v0  ;;  %478 = vst [vmem:[%s810_s25 + $0x8] sm:$0xff] %v674_v60  ;;  %v679_v15 = vsel %vm328_vm4, 1.0, %v754_v0 }
  0x1b   : > { %vm910_vm1 = vmand %vm332_vm12, %vm861_vm5  ;;  %v676_v6 = vsel %vm902_vm15, 1.0, %v754_v0  ;;  %479 = vst [vmem:[%s810_s25 + $0x10] sm:$0xff] %v675_v61 }
  0x1c   : > { %v343_v16 = vrot.slane %v342_v14, 2  ;;  %v352_v20 = vrot.slane %v351_v17, 2  ;;  %vm929_vm2 = vmand %vm333_vm14, %vm874_vm8  ;;  %480 = vst [vmem:[%s810_s25 + $0x18] sm:$0xff] %v676_v6 }
  0x1d   : > { %507 = vst [vmem:[%s822_s5] sm:$0xff] %v679_v15 }
  0x1e   : > { %v344_v19 = vmax.f32 %v342_v14, %v343_v16  ;;  %v353_v22 = vmax.f32 %v351_v17, %v352_v20  ;;  %v680_v16 = vsel %vm329_vm6, 1.0, %v754_v0  ;;  %v682_v20 = vsel %vm331_vm11, 1.0, %v754_v0 }
  0x1f   : > { %508 = vst [vmem:[%s822_s5 + $0x8] sm:$0xff] %v680_v16 }
  0x20   : > { %v345_v21 = vrot.slane %v344_v19, 1  ;;  %v354_v24 = vrot.slane %v353_v22, 1  ;;  %510 = vst [vmem:[%s822_s5 + $0x18] sm:$0xff] %v682_v20 }
  0x22   : > { %v346_v23 = vmax.f32 %v344_v19, %v345_v21  ;;  %v355_v29 = vmax.f32 %v353_v22, %v354_v24  ;;  %v487_v21 = vld [vmem:[%s822_s5 + $0x20] sm:$0x7]  ;;  %v683_v22 = vsel %vm332_vm12, 1.0, %v754_v0  ;;  %v488_v24 = vld [vmem:[%s822_s5 + $0x28] sm:$0x7] }
  0x23   : > { %v506_v35 = vadd.f32 %v684_v25, %v488_v24 }
  0x24   : > { %v838_v26 = vsub.f32 %v306_v1, %v346_v23  ;;  %v840_v27 = vsub.f32 %v308_v3, %v346_v23  ;;  %v842_v28 = vsub.f32 %v310_v2, %v346_v23  ;;  %v849_v34 = vsub.f32 %v307_v5, %v355_v29  ;;  %v458_v3 = vld [vmem:[%s810_s25 + $0x28] sm:$0x7] }
  0x25   : > { %v851_v38 = vsub.f32 %v309_v8, %v355_v29  ;;  %v853_v39 = vsub.f32 %v311_v7, %v355_v29  ;;  %v677_v7 = vsel %vm910_vm1, 1.0, %v754_v0  ;;  %v678_v8 = vsel %vm929_vm2, 1.0, %v754_v0  ;;  %512 = vst [vmem:[%s822_s5 + $0x28] sm:$0x7] %v506_v35 }
  0x26   : > { %v362_v31 = vmul.f32 1.442695, %v838_v26  ;;  %v366_v32 = vmul.f32 1.442695, %v840_v27  ;;  %v370_v33 = vmul.f32 1.442695, %v842_v28  ;;  %v475_v11 = vadd.f32 %v677_v7, %v457_v62 }
  0x27   : > { %v364_v42 = vmul.f32 1.442695, %v849_v34  ;;  %v368_v43 = vmul.f32 1.442695, %v851_v38  ;;  %v372_v44 = vmul.f32 1.442695, %v853_v39  ;;  %v476_v12 = vadd.f32 %v678_v8, %v458_v3 }
  0x28   : > { %714 = vpow2.f32 %v362_v31  ;;  %481 = vst [vmem:[%s810_s25 + $0x20] sm:$0x7] %v475_v11 }
  0x29   : > { %716 = vpow2.f32 %v366_v32  ;;  %482 = vst [vmem:[%s810_s25 + $0x28] sm:$0x7] %v476_v12  ;;  %v505_v32 = vadd.f32 %v683_v22, %v487_v21 }
  0x2a   : > { %718 = vpow2.f32 %v370_v33 }
  0x2b   : > { %720 = vpow2.f32 %v364_v42  ;;  %511 = vst [vmem:[%s822_s5 + $0x20] sm:$0x7] %v505_v32 }
  0x2c   : > { %722 = vpow2.f32 %v368_v43 }
  0x2d   : > { %724 = vpow2.f32 %v372_v44 }
  0x2e   : > { %v715_v52 = vpop.eup %714 }
  0x2f   : > { %v717_v54 = vpop.eup %716 }
  0x30   : > { %v719_v56 = vpop.eup %718  ;;  %v374_v57 = vadd.f32 %v717_v54, %v715_v52 }
  0x31   : > { %v721_v63 = vpop.eup %720  ;;  %v375_v1 = vsel %vm337_vm0, %v719_v56, 0.0 }
  0x32   : > { %v723_v4 = vpop.eup %722  ;;  %v376_v5 = vadd.f32 %v375_v1, %v374_v57 }
  0x33   : > { %v725_v9 = vpop.eup %724  ;;  %v383_v10 = vadd.f32 %v723_v4, %v721_v63 }
  0x34   : > { %v377_v13 = vrot.slane %v376_v5, 4  ;;  %v384_v14 = vsel %vm337_vm0, %v725_v9, 0.0 }
  0x35   : > { %v385_v17 = vadd.f32 %v384_v14, %v383_v10 }
  0x36   : > { %v378_v19 = vadd.f32 %v377_v13, %v376_v5 }
  0x37   : > { %v386_v23 = vrot.slane %v385_v17, 4 }
  0x38   : > { %v379_v29 = vrot.slane %v378_v19, 2 }
  0x39   : > { %v387_v31 = vadd.f32 %v386_v23, %v385_v17 }
  0x3a   : > { %v380_v33 = vadd.f32 %v379_v29, %v378_v19 }
  0x3b   : > { %v388_v30 = vrot.slane %v387_v31, 2 }
  0x3c   : > { %v381_v36 = vrot.slane %v380_v33, 1 }
  0x3d   : > { %v389_v37 = vadd.f32 %v388_v30, %v387_v31 }
  0x3e   : > { %v382_v40 = vadd.f32 %v381_v36, %v380_v33 }
  0x3f   : > { %v390_v41 = vrot.slane %v389_v37, 1 }
  0x40   : > { %726 = vlog2.f32 %v382_v40 }
  0x41   : > { %v391_v0 = vadd.f32 %v390_v41, %v389_v37 }
  0x43   : > { %728 = vlog2.f32 %v391_v0 }
  0x46   : > { %v727_v42 = vpop.eup %726 }
  0x47   : > { %v393_v43 = vmul.f32 0.6931472, %v727_v42 }
  0x49   : > { %v729_v44 = vpop.eup %728  ;;  %v396_v45 = vsub.f32 %v393_v43, %v838_v26  ;;  %v398_v46 = vsub.f32 %v393_v43, %v840_v27  ;;  %v400_v47 = vsub.f32 %v393_v43, %v842_v28 }
  0x4a   : > { %v395_v48 = vmul.f32 0.6931472, %v729_v44 }
  0x4b   : > { %v435_v52 = vsel %vm870_vm7, %v396_v45, 0.0  ;;  %v437_v54 = vsel %vm893_vm13, %v398_v46, 0.0  ;;  %v439_v26 = vsel %vm910_vm1, %v400_v47, 0.0 }
  0x4c   : > { %v397_v56 = vsub.f32 %v395_v48, %v849_v34  ;;  %v399_v27 = vsub.f32 %v395_v48, %v851_v38  ;;  %v445_v28 = vadd.f32 %v439_v26, %v433_v50  ;;  %v401_v57 = vsub.f32 %v395_v48, %v853_v39  ;;  %447 = vst [vmem:[%s805_s22] sm:$0xff] %v435_v52 }
  0x4d   : > { %449 = vst [vmem:[%s805_s22 + $0x10] sm:$0xff] %v437_v54 }
  0x4e   : > { %v436_v49 = vsel %vm882_vm9, %v397_v56, 0.0  ;;  %v438_v53 = vsel %vm902_vm15, %v399_v27, 0.0  ;;  %v440_v58 = vsel %vm929_vm2, %v401_v57, 0.0  ;;  %451 = vst [vmem:[%s805_s22 + $0x20] sm:$0x7] %v445_v28 }
  0x4f   : > { %v446_v60 = vadd.f32 %v440_v58, %v434_v59  ;;  %448 = vst [vmem:[%s805_s22 + $0x8] sm:$0xff] %v436_v49 }
  0x50   : > { %450 = vst [vmem:[%s805_s22 + $0x18] sm:$0xff] %v438_v53 }
  0x51   : > { %452 = vst [vmem:[%s805_s22 + $0x28] sm:$0x7] %v446_v60 }
  0x52 PF: > { %s15_s17 = sadd.s32 1, %s752_s17   ;;  %s1032_s15 = smov %s748_s16 }
  0x53   : > { %p12_p5 = scmp.ge.s32.totalorder %s15_s17, 4   ;;  %s1033_s16 = smov %s1035_s18 }
  0x55   :  { %14 = sbr.rel (!%p12_p5) target bundleno = 2 (0x2), region = 89 }

</bundles_post_ra>
